<compile_context>
chip_gen: v7x
topology: tpu7x:2x2x1
jax: 0.10.0
libtpu: 0.0.40
codegen_flags: <defaults>
</compile_context>

<pallas_src>
import jax
import jax.numpy as jnp
from jax.experimental import pallas as pl
from jax.experimental.pallas import tpu as pltpu


def _make_copy_kernel(chunk_bounds):
    """Build an HBM->HBM copy kernel.

    chunk_bounds: None for a single whole-array DMA, otherwise a tuple of
    static (start, size) pairs along the leading axis — one concurrent DMA
    descriptor per chunk.
    """

    def kernel(x_hbm_ref, o_hbm_ref, sem):
        if chunk_bounds is None:
            cp = pltpu.make_async_copy(x_hbm_ref, o_hbm_ref, sem.at[0])
            cp.start()
            cp.wait()
            return

        copies = []
        # Start every chunk DMA before waiting on any of them so several
        # descriptors are outstanding simultaneously.
        for i, (start, size) in enumerate(chunk_bounds):
            cp = pltpu.make_async_copy(
                x_hbm_ref.at[pl.ds(start, size)],
                o_hbm_ref.at[pl.ds(start, size)],
                sem.at[i],
            )
            cp.start()
            copies.append(cp)
        for cp in copies:
            cp.wait()

    return kernel


def identity(
    x: jax.Array,
    *,
    min_pallas_bytes: int = 256 * 1024,
    target_chunk_bytes: int = 16 * 1024 * 1024,
    max_chunks: int = 8,
) -> jax.Array:
    """Pallas equivalent of torch.Tensor.clone(): a fresh buffer with identical
    values, shape and dtype.  No wrapper-side pad/reshape/slice."""
    # Advisory only; sub-byte dtypes (int4/fp4) would over-report slightly.
    nbytes = int(x.size) * jnp.dtype(x.dtype).itemsize

    # Tiny tensors: the custom-call + DMA-descriptor fixed cost dwarfs the
    # traffic; let XLA do the copy.
    if nbytes < min_pallas_bytes:
        return jnp.copy(x)

    # Decide how many concurrent chunk DMAs to issue (static, along axis 0).
    lead = x.shape[0] if x.ndim >= 1 else 1
    n_chunks = 1
    if x.ndim >= 1 and nbytes >= 2 * target_chunk_bytes:
        n_chunks = int(min(max_chunks, max(1, nbytes // target_chunk_bytes), lead))

    if n_chunks <= 1:
        chunk_bounds = None
        n_sems = 1
    else:
        base, rem = divmod(lead, n_chunks)
        bounds = []
        start = 0
        for i in range(n_chunks):
            size = base + (1 if i < rem else 0)
            bounds.append((start, size))
            start += size
        chunk_bounds = tuple(bounds)
        n_sems = n_chunks

    kernel = _make_copy_kernel(chunk_bounds)

    return pl.pallas_call(
        kernel,
        out_shape=jax.ShapeDtypeStruct(x.shape, x.dtype),
        in_specs=[pl.BlockSpec(memory_space=pl.ANY)],   # stay in HBM
        out_specs=pl.BlockSpec(memory_space=pl.ANY),    # stay in HBM
        scratch_shapes=[pltpu.SemaphoreType.DMA((n_sems,))],
        cost_estimate=pl.CostEstimate(
            flops=0, transcendentals=0, bytes_accessed=2 * nbytes
        ),
    )(x)


if __name__ == "__main__":
    k0, k1 = jax.random.split(jax.random.PRNGKey(0))

    # Small NCHW input consistent with the module's forward.
    x = jax.random.normal(k0, (2, 4, 16, 16), dtype=jnp.float32)   # 8 KiB

    # 1) Default path: tiny tensor routes to the XLA-native copy.
    y_default = identity(x)
    jax.block_until_ready(y_default)
    assert y_default.shape == x.shape and y_default.dtype == x.dtype
    assert bool(jnp.all(y_default == x))

    # 2) Force the Pallas single-DMA path on the same small tensor.
    y_single = identity(x, min_pallas_bytes=0)
    jax.block_until_ready(y_single)
    assert y_single.shape == x.shape and y_single.dtype == x.dtype
    assert bool(jnp.all(y_single == x))

    # 3) Exercise the multi-chunk concurrent-DMA path on a modest tensor by
    #    lowering the chunking threshold (512 KiB -> 8 x 64 KiB chunk DMAs).
    x_big = jax.random.normal(k1, (8, 4, 64, 64), dtype=jnp.float32)
    y_chunked = identity(x_big, min_pallas_bytes=0, target_chunk_bytes=64 * 1024)
    jax.block_until_ready(y_chunked)
    assert y_chunked.shape == x_big.shape and y_chunked.dtype == x_big.dtype
    assert bool(jnp.all(y_chunked == x_big))

    print("KERNEL_OK")
</pallas_src>

<mosaic_0001>
module attributes {stable_mosaic.version = 11 : i64} {
  func.func @kernel(%arg0: memref<2x4x16x16xf32, #tpu.memory_space<any>>, %arg1: memref<2x4x16x16xf32, #tpu.memory_space<any>>, %arg2: memref<1x!tpu.dma_semaphore, #tpu.memory_space<semaphore_mem>>) attributes {dimension_semantics = [], scalar_prefetch = 0 : i64, scratch_operands = 1 : i64, tpu.core_type = #tpu.core_type<tc>} {
    %c0_i32 = arith.constant 0 : i32
    %0 = tpu.memref_slice %arg2[%c0_i32] : memref<1x!tpu.dma_semaphore, #tpu.memory_space<semaphore_mem>> -> memref<1x!tpu.dma_semaphore, #tpu.memory_space<semaphore_mem>>
    %1 = tpu.memref_squeeze %0 : memref<1x!tpu.dma_semaphore, #tpu.memory_space<semaphore_mem>> -> memref<!tpu.dma_semaphore, #tpu.memory_space<semaphore_mem>>
    tpu.enqueue_dma source(%arg0 : memref<2x4x16x16xf32, #tpu.memory_space<any>>) target(%arg1 : memref<2x4x16x16xf32, #tpu.memory_space<any>>) target_semaphore(%1 : memref<!tpu.dma_semaphore, #tpu.memory_space<semaphore_mem>>)
    %c0_i32_0 = arith.constant 0 : i32
    %2 = tpu.memref_slice %arg2[%c0_i32_0] : memref<1x!tpu.dma_semaphore, #tpu.memory_space<semaphore_mem>> -> memref<1x!tpu.dma_semaphore, #tpu.memory_space<semaphore_mem>>
    %3 = tpu.memref_squeeze %2 : memref<1x!tpu.dma_semaphore, #tpu.memory_space<semaphore_mem>> -> memref<!tpu.dma_semaphore, #tpu.memory_space<semaphore_mem>>
    tpu.wait_dma2 semaphore(%3 : memref<!tpu.dma_semaphore, #tpu.memory_space<semaphore_mem>>) src(%arg0 : memref<2x4x16x16xf32, #tpu.memory_space<any>>) dst(%arg1 : memref<2x4x16x16xf32, #tpu.memory_space<any>>)
    return
  }
}

</mosaic_0001>

<bundles_post_ra>
// kernel: tpu_custom_call.1
= control target key start
LH: loop header
LB: loop body
LE: loop exit
PB: predicated region body
PF: predicated region fallthrough
CT: control target
= control target key end

     0   :  { %s36_s6 = smov [#allocation2]   ;;  %s37_s7 = smov [#allocation3]   ;;  %s55_s0 = inlined_call_operand.hbm [shape: f32[2,4,16,16], index: 0, kind: input, shape index: {}]   ;;  %s56_s1 = inlined_call_operand.hbm [shape: f32[2,4,16,16], index: 1, kind: output, shape index: {}]  }
   0x1   :  { %s38_s8 = smov 0  }
   0x2   :  { %18 = dma.general %s55_s0, 2048, %s56_s1, %s36_s6, %s37_s7, [#allocation4], %s38_s8, 0  }
   0x3   :  { %34 = dma.done.wait [#allocation2], 2048 }
   0x4   :  { %35 = vsyncadd [#allocation2], 4294965248 }
   0x5   :  { %24 = vsyncmov [#allocation2] }
   0x8   :  { %s25_s13 = vpop.sfrf %24 }
   0x9   :  { %p30_p0 = scmp.ne.s32.totalorder %s25_s13, 0 }
   0xb   :  { %29 = shalt.err (%p30_p0)  }

</bundles_post_ra>
